<compile_context>
chip_gen: v7x
topology: tpu7x:2x2x1
jax: 0.10.0
libtpu: 0.0.40
codegen_flags: <defaults>
</compile_context>

<pallas_src>
import jax
import jax.numpy as jnp
from jax import lax
from jax.experimental import pallas as pl
from jax.experimental.pallas import tpu as pltpu

_FOLD = 8  # batch rows folded into each lane-dense output row


def _folded_kernel(xf_ref, wf_ref, bf_ref, of_ref):
    # xf_ref: (TMf, _FOLD)  wf_ref: (_FOLD, _FOLD*O)  bf_ref: (1, _FOLD*O)  of_ref: (TMf, _FOLD*O)
    y = jnp.dot(xf_ref[...], wf_ref[...], preferred_element_type=jnp.float32)
    of_ref[...] = jnp.tanh(y + bf_ref[...]).astype(of_ref.dtype)


def _k1_vpu_kernel(x_ref, w_ref, b_ref, o_ref):
    # input_dim == 1 fallback: pure VPU broadcast outer product, MXU untouched.
    # x_ref: (TM, 1)  w_ref: (1, O)  b_ref: (1, O)  o_ref: (TM, O)
    y = x_ref[...].astype(jnp.float32) * w_ref[...].astype(jnp.float32) + b_ref[...]
    o_ref[...] = jnp.tanh(y).astype(o_ref.dtype)


def _linear_tanh_kernel(x_ref, w_ref, b_ref, o_ref):
    # General input_dim: contract x's last dim with the *native* (O, K) weight's last
    # dim (no host-side transpose); f32 accumulation, tanh in f32, cast at the store.
    # HIGHEST precision: this path only triggers for small fallback shapes, and it
    # keeps the result bit-close to the XLA reference matmul.
    y = lax.dot_general(
        x_ref[...],
        w_ref[...],
        dimension_numbers=(((1,), (1,)), ((), ())),
        preferred_element_type=jnp.float32,
        precision=lax.Precision.HIGHEST,
    )
    o_ref[...] = jnp.tanh(y + b_ref[...]).astype(o_ref.dtype)


def _cost(B, K, O):
    return pl.CostEstimate(
        flops=2 * B * K * O,
        transcendentals=B * O,
        bytes_accessed=4 * (B * K + K * O + O + B * O),
    )


def turn_scaler(x, weight, bias, *, block_rows=1024):
    """tanh(x @ weight.T + bias) -- matches TurnScaler.forward.

    Args:
      x:      (B, input_dim) float32
      weight: (output_dim, input_dim) float32  (native nn.Linear layout)
      bias:   (output_dim,) float32
    Returns:
      (B, output_dim), dtype of x.
    """
    B, K = x.shape
    O = weight.shape[0]
    compiler_params = pltpu.CompilerParams(dimension_semantics=("parallel",))
    cost = _cost(B, K, O)

    if K == 1 and (_FOLD * O) % 128 == 0:
        # --- lane-dense folded path (the module's default shapes land here) ---
        Of = _FOLD * O
        bf_rows = pl.cdiv(B, _FOLD)                      # folded rows actually needed
        tile = bf_rows if bf_rows <= block_rows else block_rows
        bf_pad = pl.cdiv(bf_rows, tile) * tile           # whole number of tiles
        b_pad = bf_pad * _FOLD

        x_flat = x.reshape(B)                            # free: K == 1
        if b_pad != B:
            x_flat = jnp.pad(x_flat, (0, b_pad - B))
        x_fold = x_flat.reshape(bf_pad, _FOLD)

        w_row = weight.reshape(1, O).astype(x.dtype)     # free reshape, no transpose copy
        w_fold = jnp.kron(jnp.eye(_FOLD, dtype=x.dtype), w_row)      # (_FOLD, _FOLD*O)
        b_fold = jnp.tile(bias.astype(jnp.float32).reshape(1, O), (1, _FOLD))

        out_fold = pl.pallas_call(
            _folded_kernel,
            out_shape=jax.ShapeDtypeStruct((bf_pad, Of), x.dtype),
            grid=(bf_pad // tile,),
            in_specs=[
                pl.BlockSpec((tile, _FOLD), lambda i: (i, 0)),
                pl.BlockSpec((_FOLD, Of), lambda i: (0, 0)),   # weight resident in VMEM
                pl.BlockSpec((1, Of), lambda i: (0, 0)),       # bias resident in VMEM
            ],
            out_specs=pl.BlockSpec((tile, Of), lambda i: (i, 0)),
            compiler_params=compiler_params,
            cost_estimate=cost,
        )(x_fold, w_fold, b_fold)
        # (bf_pad, _FOLD*O) -> (b_pad, O) is a free row-major reshape; drop pad rows.
        return out_fold.reshape(b_pad, O)[:B]

    # --- row-tiled fallback paths ---
    tile = B if B <= block_rows else block_rows
    b_pad = pl.cdiv(B, tile) * tile
    x_p = jnp.pad(x, ((0, b_pad - B), (0, 0))) if b_pad != B else x
    b2d = bias.astype(jnp.float32).reshape(1, O)

    if K == 1:
        kernel = _k1_vpu_kernel
        w_arg = weight.reshape(1, O).astype(x.dtype)     # free reshape; VPU path, no MXU
        w_spec = pl.BlockSpec((1, O), lambda i: (0, 0))
    else:
        kernel = _linear_tanh_kernel
        w_arg = weight.astype(x.dtype)                   # native (O, K); no transpose
        w_spec = pl.BlockSpec((O, K), lambda i: (0, 0))

    out = pl.pallas_call(
        kernel,
        out_shape=jax.ShapeDtypeStruct((b_pad, O), x.dtype),
        grid=(b_pad // tile,),
        in_specs=[
            pl.BlockSpec((tile, K), lambda i: (i, 0)),
            w_spec,
            pl.BlockSpec((1, O), lambda i: (0, 0)),
        ],
        out_specs=pl.BlockSpec((tile, O), lambda i: (i, 0)),
        compiler_params=compiler_params,
        cost_estimate=cost,
    )(x_p, w_arg, b2d)
    return out[:B]


if __name__ == "__main__":
    key = jax.random.PRNGKey(0)
    k_x, k_w, k_b, k_x2, k_w2, k_b2 = jax.random.split(key, 6)

    # Default TurnScaler shapes: nn.Linear(1, 16), small batch.
    input_dim, output_dim, batch = 1, 16, 8
    x = jax.random.normal(k_x, (batch, input_dim), dtype=jnp.float32)
    weight = jax.random.normal(k_w, (output_dim, input_dim), dtype=jnp.float32) * 0.5
    bias = jax.random.normal(k_b, (output_dim,), dtype=jnp.float32) * 0.1

    out = jax.block_until_ready(turn_scaler(x, weight, bias))
    ref = jnp.tanh(x @ weight.T + bias)
    assert out.shape == (batch, output_dim)
    assert jnp.allclose(out, ref, atol=1e-5), "mismatch vs reference (folded path)"

    # Exercise the multi-tile pipelined grid and ragged-batch padding on the
    # lane-dense path (small block_rows so the grid has several steps).
    xb = jax.random.normal(k_x2, (250, input_dim), dtype=jnp.float32)
    outb = jax.block_until_ready(turn_scaler(xb, weight, bias, block_rows=8))
    refb = jnp.tanh(xb @ weight.T + bias)
    assert outb.shape == (250, output_dim)
    assert jnp.allclose(outb, refb, atol=1e-5), "mismatch vs reference (tiled folded path)"

    # Exercise the general input_dim > 1 fallback (native-layout weight, dot_general).
    in2, out2, b2 = 8, 24, 16
    x2 = jax.random.normal(k_x2, (b2, in2), dtype=jnp.float32)
    w2 = jax.random.normal(k_w2, (out2, in2), dtype=jnp.float32) * 0.3
    bias2 = jax.random.normal(k_b2, (out2,), dtype=jnp.float32) * 0.1
    o2 = jax.block_until_ready(turn_scaler(x2, w2, bias2))
    r2 = jnp.tanh(x2 @ w2.T + bias2)
    assert jnp.allclose(o2, r2, atol=1e-4), "mismatch vs reference (general path)"

    print("KERNEL_OK")
</pallas_src>

<mosaic_0001>
module attributes {stable_mosaic.version = 11 : i64} {
  func.func @_folded_kernel(%arg0: i32, %arg1: memref<1x8xf32, #tpu.memory_space<vmem>>, %arg2: memref<8x128xf32, #tpu.memory_space<vmem>>, %arg3: memref<1x128xf32, #tpu.memory_space<vmem>>, %arg4: memref<1x128xf32, #tpu.memory_space<vmem>>) attributes {dimension_semantics = [#tpu.dimension_semantics<parallel>], iteration_bounds = array<i64: 1>, scalar_prefetch = 0 : i64, scratch_operands = 0 : i64, tpu.core_type = #tpu.core_type<tc>, window_params = [{transform_indices = @transform_0, window_bounds = array<i64: 1, 8>}, {pipeline_mode = #tpu.pipeline_mode<synchronous>, transform_indices = @transform_1, window_bounds = array<i64: 8, 128>}, {pipeline_mode = #tpu.pipeline_mode<synchronous>, transform_indices = @transform_2, window_bounds = array<i64: 1, 128>}, {transform_indices = @transform_3, window_bounds = array<i64: 1, 128>}]} {
    %c0 = arith.constant 0 : index
    %c0_0 = arith.constant 0 : index
    %0 = vector.load %arg1[%c0, %c0_0] : memref<1x8xf32, #tpu.memory_space<vmem>>, vector<1x8xf32>
    %c0_1 = arith.constant 0 : index
    %c0_2 = arith.constant 0 : index
    %1 = vector.load %arg2[%c0_1, %c0_2] : memref<8x128xf32, #tpu.memory_space<vmem>>, vector<8x128xf32>
    %cst = arith.constant dense<0.000000e+00> : vector<1x128xf32>
    %2 = tpu.matmul %0, %1, %cst {dimension_numbers = #tpu.dot_dimension_numbers<[1], [0], [0], [1], [0, 0, 1, 1], [], []>} : vector<1x8xf32>, vector<8x128xf32>, vector<1x128xf32> -> vector<1x128xf32>
    %c0_3 = arith.constant 0 : index
    %c0_4 = arith.constant 0 : index
    %3 = vector.load %arg3[%c0_3, %c0_4] : memref<1x128xf32, #tpu.memory_space<vmem>>, vector<1x128xf32>
    %4 = arith.addf %2, %3 : vector<1x128xf32>
    %5 = math.tanh %4 : vector<1x128xf32>
    %c0_5 = arith.constant 0 : index
    %c0_6 = arith.constant 0 : index
    %6 = vector.load %arg4[%c0_5, %c0_6] : memref<1x128xf32, #tpu.memory_space<vmem>>, vector<1x128xf32>
    tpu.vector_store %arg4[%c0_5, %c0_6], %5 {strides = array<i32>} : memref<1x128xf32, #tpu.memory_space<vmem>>, vector<1x128xf32>,
    return
  }
  func.func @transform_0(%arg0: i32) -> (i32, i32) {
    %c0_i32 = arith.constant 0 : i32
    %c0_i32_0 = arith.constant 0 : i32
    return %arg0, %c0_i32 : i32, i32
  }
  func.func @transform_1(%arg0: i32) -> (i32, i32) {
    %c0_i32 = arith.constant 0 : i32
    %c0_i32_0 = arith.constant 0 : i32
    %c0_i32_1 = arith.constant 0 : i32
    return %c0_i32, %c0_i32_0 : i32, i32
  }
  func.func @transform_2(%arg0: i32) -> (i32, i32) {
    %c0_i32 = arith.constant 0 : i32
    %c0_i32_0 = arith.constant 0 : i32
    %c0_i32_1 = arith.constant 0 : i32
    return %c0_i32, %c0_i32_0 : i32, i32
  }
  func.func @transform_3(%arg0: i32) -> (i32, i32) {
    %c0_i32 = arith.constant 0 : i32
    %c0_i32_0 = arith.constant 0 : i32
    return %arg0, %c0_i32 : i32, i32
  }
}

</mosaic_0001>

<bundles_post_ra>
// kernel: tpu_custom_call.1
= control target key start
LH: loop header
LB: loop body
LE: loop exit
PB: predicated region body
PF: predicated region fallthrough
CT: control target
= control target key end

     0   :  { %8 = vsyncpa [#allocation3], 0  ;;  %s285_s0 = inlined_call_operand.hbm [shape: f32[1,8], index: 0, kind: input, shape index: {}]   ;;  %s286_s1 = inlined_call_operand.hbm [shape: f32[8,128], index: 1, kind: input, shape index: {}]   ;;  %s287_s2 = inlined_call_operand.vmem [shape: f32[1,128], index: 2, kind: input, shape index: {}]   ;;  %s288_s3 = inlined_call_operand.hbm [shape: f32[1,128], index: 3, kind: output, shape index: {}]  }
   0x1   :  { %9 = vsyncpa [#allocation6], 0 }
   0x2   :  { %10 = vsyncpa [#allocation4], 0  ;;  %s221_s12 = smov [#allocation2]   ;;  %s222_s14 = smov [#allocation5]  }
   0x3   :  { %s17_s13 = sshll.u32 %s221_s12, 4  ;;  %s27_s15 = sshll.u32 %s222_s14, 4  ;;  %s18_s13 = int_to_ptr.vmem [resolvable:$true] %s17_s13  ;;  %s28_s15 = int_to_ptr.vmem [resolvable:$true] %s27_s15 }
   0x4   :  { %s149_s18 = scalar_lea.hbm %s285_s0, 16 }
   0x5   :  { %p150_p0 = scmp.ne.s32.totalorder %s285_s0, %s149_s18  ;;  %p153_p1 = scmp.lt.u32.totalorder %s149_s18, %s285_s0 }
   0x7   :  { %p155_p2 = pnand %p153_p1, %p150_p0 }
   0x9   :  { %158 = shalt.err (!%p155_p2)
}
   0xa   :  { %s159_s23 = scalar_lea.vmem %s18_s13, 16  ;;  %s163_s24 = scalar_lea.vmem %s18_s13, 32 }
   0xb   :  { %p160_p3 = scmp.ne.s32.totalorder %s18_s13, %s159_s23  ;;  %p164_p4 = scmp.lt.s32.totalorder %s18_s13, %s18_s13 }
   0xc   :  { %p165_p5 = scmp.lt.s32.totalorder %s163_s24, %s159_s23 }
   0xe   :  { %p166_p6 = por %p165_p5, %p164_p4 }
  0x10   :  { %p167_p7 = pnand %p166_p6, %p160_p3 }
  0x12   :  { %170 = shalt.err (!%p167_p7)
}
  0x13   :  { %20 = dma.hbm_to_vmem [thread:$0]  %s285_s0, 16, %s18_s13, [#allocation3]  }
  0x14   :  { %s171_s29 = scalar_lea.hbm %s286_s1, 128 }
  0x15   :  { %p172_p8 = scmp.ne.s32.totalorder %s286_s1, %s171_s29  ;;  %p175_p9 = scmp.lt.u32.totalorder %s171_s29, %s286_s1 }
  0x17   :  { %p177_p10 = pnand %p175_p9, %p172_p8 }
  0x19   :  { %180 = shalt.err (!%p177_p10)
}
  0x1a   :  { %s181_s7 = scalar_lea.vmem %s28_s15, 128  ;;  %p186_p12 = scmp.lt.s32.totalorder %s28_s15, %s28_s15 }
  0x1b   :  { %p182_p11 = scmp.ne.s32.totalorder %s28_s15, %s181_s7  ;;  %p187_p13 = scmp.lt.s32.totalorder %s181_s7, %s181_s7 }
  0x1d   :  { %p188_p0 = por %p187_p13, %p186_p12 }
  0x1f   :  { %p189_p1 = pnand %p188_p0, %p182_p11 }
  0x21   :  { %192 = shalt.err (!%p189_p1)
}
  0x22   :  { %30 = dma.hbm_to_vmem [thread:$0]  %s286_s1, 128, %s28_s15, [#allocation6]  }
  0x23   :  { %215 = dma.done.wait [#allocation3], 16  }
  0x24   :  { %216 = vsyncadd [#allocation3], 4294967280 }
  0x25   :  { %217 = dma.done.wait [#allocation6], 128  }
  0x26   :  { %218 = vsyncadd [#allocation6], 4294967168  ;;  %v223_v0 = vmov 0.0   ;;  %vm224_vm0 = vmmov 0   ;;  %vm42_vm1 = vcmask 64512   ;;  %v40_v1 = vld [vmem:[#allocation5] sm:$0xff] }
  0x27   :  { %137 = vmatprep.subr.mxu0 %v223_v0  ;;  %139 = vmatprep.mubr.msk.f32.mxu0 %vm224_vm0, %v223_v0  ;;  %v39_v2 = vld [vmem:[#allocation2] sm:$0x1]  ;;  %s225_s1 = smov [#allocation7]  }
  0x28   :  { %138 = vmatpush3.msra.mxu0 %v40_v1  ;;  %v41_v3 = vld [vmem:[%s287_s2] sm:$0x1]  ;;  %s124_s11 = sshll.u32 %s225_s1, 4  ;;  %s125_s11 = int_to_ptr.vmem [resolvable:$true] %s124_s11 }
  0x29   :  { %140 = vmatmul.mubr.msk.f32.vlgmr.msra.gmra.mrb[0].mxu0 %vm42_vm1, %v39_v2  ;;  %s193_s12 = scalar_lea.vmem %s125_s11, 16  ;;  %s197_s13 = scalar_lea.vmem %s125_s11, 32 }
  0x2a   :  { %p194_p2 = scmp.ne.s32.totalorder %s125_s11, %s193_s12  ;;  %p198_p3 = scmp.lt.s32.totalorder %s125_s11, %s125_s11 }
  0x2b   :  { %p199_p4 = scmp.lt.s32.totalorder %s197_s13, %s193_s12 }
  0x2d   :  { %p200_p5 = por %p199_p4, %p198_p3 }
  0x2f   :  { %p201_p6 = pnand %p200_p5, %p194_p2 }
  0xfc   :  { %v112_v4 = vpop.f32.mrb[0].mxu0 }
  0xfd   :  { %v113_v5 = vadd.f32 %v112_v4, %v41_v3  ;;  %v141_v6 = vpop.f32.mrb[1].mxu0 }
  0xff   :  { %147 = vtanh.f32 %v113_v5 }
 0x109   :  { %v148_v7 = vpop.eup %147 }
 0x10a   :  { %117 = vst [vmem:[#allocation7] sm:$0x1] %v148_v7 }
 0x10b   :  { %204 = shalt.err (!%p201_p6)
}
 0x10c   :  { %s205_s2 = scalar_lea.hbm %s288_s3, 16 }
 0x10d   :  { %p206_p7 = scmp.ne.s32.totalorder %s288_s3, %s205_s2  ;;  %p209_p8 = scmp.lt.u32.totalorder %s205_s2, %s288_s3 }
 0x10f   :  { %p211_p9 = pnand %p209_p8, %p206_p7 }
 0x111   :  { %214 = shalt.err (!%p211_p9)
}
 0x112   :  { %127 = dma.vmem_to_hbm [thread:$0]  %s125_s11, 16, %s288_s3, [#allocation4]  }
 0x113   :  { %219 = dma.done.wait [#allocation4], 16  }
 0x114   :  { %220 = vsyncadd [#allocation4], 4294967280 }
 0x115   :  { %131 = vsyncpa [#allocation3], 1 }
 0x116   :  { %132 = vsyncpa [#allocation6], 1 }
 0x117   :  { %133 = vsyncpa [#allocation4], 1 }

</bundles_post_ra>
